<compile_context>
chip_gen: v7x
topology: tpu7x:2x2x1
jax: 0.10.0
libtpu: 0.0.40
codegen_flags: <defaults>
</compile_context>

<pallas_src>
import functools

import jax
import jax.numpy as jnp
from jax.experimental import pallas as pl
from jax.experimental.pallas import tpu as pltpu


_LANE = 128


def _sublane_multiple(dtype) -> int:
    """Rows per packed vreg tile: 8 for f32, 16 for bf16, 32 for int8/fp8."""
    bits = jnp.dtype(dtype).itemsize * 8
    return max(8, 256 // bits)


def _vmem_capacity_bytes() -> int:
    """Physical VMEM per TensorCore; conservative fallback if the query fails."""
    try:
        return int(pltpu.get_tpu_info().vmem_capacity_bytes)
    except Exception:
        return 64 << 20  # v7x-sized (smallest of the listed generations)


def _layer_norm_kernel(x_ref, a_ref, b_ref, o_ref, *, eps, n_true):
    # x_ref block: (R, Np); a_ref/b_ref block: (1, Np).  Np is the lane-padded
    # row length; n_true is the real normalization size (the denominator).
    x = x_ref[...].astype(jnp.float32)
    n_pad = x.shape[-1]
    inv_n = 1.0 / float(n_true)
    # Padded lanes are zero, so the plain sum gives the true-N sum.
    mean = jnp.sum(x, axis=-1, keepdims=True) * inv_n            # (R, 1)
    xc = x - mean
    if n_pad != n_true:
        # Zero the padded lanes so they don't pollute the variance (and the
        # affine below keeps them at beta_pad = 0, which is sliced off anyway).
        lane = jax.lax.broadcasted_iota(jnp.int32, x.shape, x.ndim - 1)
        xc = jnp.where(lane < n_true, xc, 0.0)
    var = jnp.sum(xc * xc, axis=-1, keepdims=True) * inv_n        # biased variance
    inv = jax.lax.rsqrt(var + eps)                                # EUP slot
    a = a_ref[...].astype(jnp.float32)                            # (1, Np) broadcasts over rows
    b = b_ref[...].astype(jnp.float32)
    # Fused normalize + affine: (x - mean) * (inv * alpha) + beta
    o_ref[...] = (xc * (inv * a) + b).astype(o_ref.dtype)


def _pick_block_rows(rows, n_pad, itemsize, sub, vmem_limit_bytes,
                     max_block_bytes=8 << 20):
    """Rows per grid step, derived from the per-step VMEM budget.

    Per-step VMEM model:
      BlockSpec buffers: (in + out) x 2 (double-buffered)     -> 4 * r * n * s
      in-kernel f32 temporaries (x_f32, xc, fused result)     -> 3 * r * n * 4
      alpha/beta buffers + their f32 casts (row-independent)  -> n * (4*s + 8)
    """
    budget = int(0.85 * vmem_limit_bytes)
    per_row = n_pad * (4 * itemsize + 12)
    fixed = n_pad * (4 * itemsize + 8)

    min_rows = min(rows, sub)
    if fixed + min_rows * per_row > budget:
        # TODO(synk): add a tiled-N fallback (2D grid with N last + 'arbitrary',
        # per-row sum/sumsq scratch, second normalize pass) for rows too wide
        # to fit a (sub, N) block in VMEM.
        raise NotImplementedError(
            f"LayerNorm row of {n_pad} lane-padded elements does not fit the "
            f"VMEM budget ({budget} bytes); tiled-N fallback not implemented.")

    if rows <= sub:
        return rows  # full leading dim is always a legal block size

    fit_budget = (budget - fixed) // per_row
    fit_cap = max_block_bytes // (n_pad * itemsize)
    r = max(sub, (min(fit_budget, fit_cap) // sub) * sub)

    if r >= rows:
        # Whole problem fits a single step: still split into >= 2 steps when
        # possible so v7x's two TensorCores both get work under "parallel".
        if rows >= 2 * sub:
            half = (rows + 1) // 2
            r = ((half + sub - 1) // sub) * sub
            if r >= rows:
                r = rows
        else:
            r = rows
    return r


def layer_norm(x, alpha, beta, eps=1e-5, block_rows=None):
    """x: (..., *dim); alpha/beta: shape `dim`. Normalizes over trailing alpha.ndim axes."""
    norm_nd = alpha.ndim
    assert x.shape[-norm_nd:] == alpha.shape == beta.shape

    rows = 1
    for d in x.shape[:-norm_nd]:
        rows *= d
    n = 1
    for d in x.shape[-norm_nd:]:
        n *= d

    # Lane-dense layout: one normalization unit per row; pad the lane axis to a
    # multiple of 128 so every store is an unmasked full-lane vst.
    n_pad = ((n + _LANE - 1) // _LANE) * _LANE
    x_r = x.reshape(rows, n)
    a_r = alpha.reshape(1, n)
    b_r = beta.reshape(1, n)
    if n_pad != n:
        pad = ((0, 0), (0, n_pad - n))
        x_r = jnp.pad(x_r, pad)
        a_r = jnp.pad(a_r, pad)
        b_r = jnp.pad(b_r, pad)

    sub = _sublane_multiple(x_r.dtype)
    vmem_cap = _vmem_capacity_bytes()
    # ~45 MiB of 64 on v7x; 64 MiB (of 128 physical) on v5e/v6e.
    vmem_limit = min(int(0.70 * vmem_cap), 64 << 20)

    if block_rows is None:
        block_rows = _pick_block_rows(rows, n_pad, x_r.dtype.itemsize, sub, vmem_limit)
    r = block_rows
    assert r == rows or r % sub == 0, (
        f"block_rows must be a multiple of {sub} (dtype {x_r.dtype}) "
        "or the full row count")

    kernel = functools.partial(_layer_norm_kernel, eps=eps, n_true=n)

    out = pl.pallas_call(
        kernel,
        out_shape=jax.ShapeDtypeStruct((rows, n_pad), x.dtype),
        grid_spec=pltpu.PrefetchScalarGridSpec(
            num_scalar_prefetch=0,
            grid=(pl.cdiv(rows, r),),
            in_specs=[
                pl.BlockSpec((r, n_pad), lambda i: (i, 0)),
                pl.BlockSpec((1, n_pad), lambda i: (0, 0)),   # constant -> resident
                pl.BlockSpec((1, n_pad), lambda i: (0, 0)),
            ],
            out_specs=pl.BlockSpec((r, n_pad), lambda i: (i, 0)),
        ),
        compiler_params=pltpu.CompilerParams(
            dimension_semantics=("parallel",),                # megacore sharding on v7x
            vmem_limit_bytes=vmem_limit,
        ),
    )(x_r, a_r, b_r)

    if n_pad != n:
        out = out[:, :n]
    return out.reshape(x.shape)


def layer_norm_ref(x, alpha, beta, eps=1e-5):
    """Pure-JAX reference mirroring the PyTorch forward."""
    axes = tuple(range(x.ndim - alpha.ndim, x.ndim))
    mean = x.mean(axis=axes, keepdims=True)
    var = ((x - mean) ** 2).mean(axis=axes, keepdims=True)
    xn = (x - mean) / jnp.sqrt(var + eps)
    return xn * alpha + beta


if __name__ == "__main__":
    keys = jax.random.split(jax.random.PRNGKey(0), 10)
    eps = 1e-5

    # 1) Module-shaped input: x is B x C x H x W, dim = (C, H, W),
    #    alpha ones / beta zeros (the module's init).
    B, C, H, W = 2, 4, 16, 16
    x = jax.random.normal(keys[0], (B, C, H, W), dtype=jnp.float32)
    alpha = jnp.ones((C, H, W), dtype=jnp.float32)
    beta = jnp.zeros((C, H, W), dtype=jnp.float32)
    out = jax.block_until_ready(layer_norm(x, alpha, beta, eps=eps))
    ref = layer_norm_ref(x, alpha, beta, eps=eps)
    assert out.shape == x.shape
    assert jnp.allclose(out, ref, atol=1e-5, rtol=1e-5), "mismatch vs reference (test 1)"

    # 2) Larger batch, non-trivial affine, explicit multi-step grid.
    B2 = 16
    x2 = jax.random.normal(keys[1], (B2, C, H, W), dtype=jnp.float32)
    alpha2 = 1.0 + 0.1 * jax.random.normal(keys[2], (C, H, W), dtype=jnp.float32)
    beta2 = 0.1 * jax.random.normal(keys[3], (C, H, W), dtype=jnp.float32)
    out2 = jax.block_until_ready(layer_norm(x2, alpha2, beta2, eps=eps, block_rows=8))
    ref2 = layer_norm_ref(x2, alpha2, beta2, eps=eps)
    assert jnp.allclose(out2, ref2, atol=1e-5, rtol=1e-5), "mismatch vs reference (test 2)"

    # 3) bf16 input: exercises the dtype-aware (16-row) sublane multiple and the
    #    automatic >=2-step split of the parallel grid axis.
    B3 = 32
    x3 = jax.random.normal(keys[4], (B3, C, H, W), dtype=jnp.float32).astype(jnp.bfloat16)
    alpha3 = (1.0 + 0.1 * jax.random.normal(keys[5], (C, H, W), jnp.float32)).astype(jnp.bfloat16)
    beta3 = (0.1 * jax.random.normal(keys[6], (C, H, W), jnp.float32)).astype(jnp.bfloat16)
    out3 = jax.block_until_ready(layer_norm(x3, alpha3, beta3, eps=eps))
    ref3 = layer_norm_ref(x3.astype(jnp.float32), alpha3.astype(jnp.float32),
                          beta3.astype(jnp.float32), eps=eps)
    assert jnp.allclose(out3.astype(jnp.float32), ref3, atol=8e-2, rtol=0), \
        "mismatch vs reference (test 3, bf16)"

    # 4) N not a multiple of 128: exercises lane padding + masked variance.
    dim4 = (3, 10, 10)   # N = 300 -> padded to 384 lanes
    B4 = 4
    x4 = jax.random.normal(keys[7], (B4,) + dim4, dtype=jnp.float32)
    alpha4 = 1.0 + 0.1 * jax.random.normal(keys[8], dim4, dtype=jnp.float32)
    beta4 = 0.1 * jax.random.normal(keys[9], dim4, dtype=jnp.float32)
    out4 = jax.block_until_ready(layer_norm(x4, alpha4, beta4, eps=eps))
    ref4 = layer_norm_ref(x4, alpha4, beta4, eps=eps)
    assert jnp.allclose(out4, ref4, atol=1e-5, rtol=1e-5), "mismatch vs reference (test 4)"

    print("KERNEL_OK")
</pallas_src>

<mosaic_0001>
module attributes {stable_mosaic.version = 11 : i64} {
  func.func @_layer_norm_kernel(%arg0: i32, %arg1: memref<2x1024xf32, #tpu.memory_space<vmem>>, %arg2: memref<1x1024xf32, #tpu.memory_space<vmem>>, %arg3: memref<1x1024xf32, #tpu.memory_space<vmem>>, %arg4: memref<2x1024xf32, #tpu.memory_space<vmem>>) attributes {dimension_semantics = [#tpu.dimension_semantics<parallel>], iteration_bounds = array<i64: 1>, scalar_prefetch = 0 : i64, scratch_operands = 0 : i64, tpu.core_type = #tpu.core_type<tc>, window_params = [{transform_indices = @transform_0, window_bounds = array<i64: 2, 1024>}, {pipeline_mode = #tpu.pipeline_mode<synchronous>, transform_indices = @transform_1, window_bounds = array<i64: 1, 1024>}, {pipeline_mode = #tpu.pipeline_mode<synchronous>, transform_indices = @transform_2, window_bounds = array<i64: 1, 1024>}, {transform_indices = @transform_3, window_bounds = array<i64: 2, 1024>}]} {
    %c0 = arith.constant 0 : index
    %c0_0 = arith.constant 0 : index
    %0 = vector.load %arg1[%c0, %c0_0] : memref<2x1024xf32, #tpu.memory_space<vmem>>, vector<2x1024xf32>
    %cst = arith.constant dense<0.000000e+00> : vector<2xf32>
    %1 = vector.multi_reduction <add>, %0, %cst [1] : vector<2x1024xf32> to vector<2xf32>
    %2 = vector.shape_cast %1 : vector<2xf32> to vector<2x1xf32>
    %cst_1 = arith.constant 9.765625E-4 : f32
    %3 = vector.broadcast %cst_1 : f32 to vector<2x1xf32>
    %4 = arith.mulf %2, %3 : vector<2x1xf32>
    %5 = vector.broadcast %4 : vector<2x1xf32> to vector<2x1024xf32>
    %6 = arith.subf %0, %5 : vector<2x1024xf32>
    %7 = arith.mulf %6, %6 : vector<2x1024xf32>
    %cst_2 = arith.constant dense<0.000000e+00> : vector<2xf32>
    %8 = vector.multi_reduction <add>, %7, %cst_2 [1] : vector<2x1024xf32> to vector<2xf32>
    %9 = vector.shape_cast %8 : vector<2xf32> to vector<2x1xf32>
    %cst_3 = arith.constant 9.765625E-4 : f32
    %10 = vector.broadcast %cst_3 : f32 to vector<2x1xf32>
    %11 = arith.mulf %9, %10 : vector<2x1xf32>
    %cst_4 = arith.constant 9.99999974E-6 : f32
    %12 = vector.broadcast %cst_4 : f32 to vector<2x1xf32>
    %13 = arith.addf %11, %12 : vector<2x1xf32>
    %14 = math.rsqrt %13 : vector<2x1xf32>
    %c0_5 = arith.constant 0 : index
    %c0_6 = arith.constant 0 : index
    %15 = vector.load %arg2[%c0_5, %c0_6] : memref<1x1024xf32, #tpu.memory_space<vmem>>, vector<1x1024xf32>
    %c0_7 = arith.constant 0 : index
    %c0_8 = arith.constant 0 : index
    %16 = vector.load %arg3[%c0_7, %c0_8] : memref<1x1024xf32, #tpu.memory_space<vmem>>, vector<1x1024xf32>
    %17 = vector.broadcast %14 : vector<2x1xf32> to vector<2x1024xf32>
    %18 = vector.broadcast %15 : vector<1x1024xf32> to vector<2x1024xf32>
    %19 = arith.mulf %17, %18 : vector<2x1024xf32>
    %20 = arith.mulf %6, %19 : vector<2x1024xf32>
    %21 = vector.broadcast %16 : vector<1x1024xf32> to vector<2x1024xf32>
    %22 = arith.addf %20, %21 : vector<2x1024xf32>
    %c0_9 = arith.constant 0 : index
    %c0_10 = arith.constant 0 : index
    %23 = vector.load %arg4[%c0_9, %c0_10] : memref<2x1024xf32, #tpu.memory_space<vmem>>, vector<2x1024xf32>
    tpu.vector_store %arg4[%c0_9, %c0_10], %22 {strides = array<i32>} : memref<2x1024xf32, #tpu.memory_space<vmem>>, vector<2x1024xf32>,
    return
  }
  func.func @transform_0(%arg0: i32) -> (i32, i32) {
    %c0_i32 = arith.constant 0 : i32
    %c0_i32_0 = arith.constant 0 : i32
    return %arg0, %c0_i32 : i32, i32
  }
  func.func @transform_1(%arg0: i32) -> (i32, i32) {
    %c0_i32 = arith.constant 0 : i32
    %c0_i32_0 = arith.constant 0 : i32
    %c0_i32_1 = arith.constant 0 : i32
    return %c0_i32, %c0_i32_0 : i32, i32
  }
  func.func @transform_2(%arg0: i32) -> (i32, i32) {
    %c0_i32 = arith.constant 0 : i32
    %c0_i32_0 = arith.constant 0 : i32
    %c0_i32_1 = arith.constant 0 : i32
    return %c0_i32, %c0_i32_0 : i32, i32
  }
  func.func @transform_3(%arg0: i32) -> (i32, i32) {
    %c0_i32 = arith.constant 0 : i32
    %c0_i32_0 = arith.constant 0 : i32
    return %arg0, %c0_i32 : i32, i32
  }
}

</mosaic_0001>

<bundles_post_ra>
// kernel: tpu_custom_call.1
= control target key start
LH: loop header
LB: loop body
LE: loop exit
PB: predicated region body
PF: predicated region fallthrough
CT: control target
= control target key end

     0   :  { %8 = vsyncpa [#allocation3], 0  ;;  %s612_s0 = inlined_call_operand.hbm [shape: f32[2,1024], index: 0, kind: input, shape index: {}]   ;;  %s613_s1 = inlined_call_operand.hbm [shape: f32[1,1024], index: 1, kind: input, shape index: {}]   ;;  %s614_s2 = inlined_call_operand.hbm [shape: f32[1,1024], index: 2, kind: input, shape index: {}]   ;;  %s615_s3 = inlined_call_operand.hbm [shape: f32[2,1024], index: 3, kind: output, shape index: {}]  }
   0x1   :  { %9 = vsyncpa [#allocation6], 0 }
   0x2   :  { %10 = vsyncpa [#allocation4], 0  ;;  %s482_s12 = smov [#allocation5]   ;;  %s483_s14 = smov [#allocation2]  }
   0x3   :  { %s27_s13 = sshll.u32 %s482_s12, 4  ;;  %s17_s15 = sshll.u32 %s483_s14, 4  ;;  %s28_s13 = int_to_ptr.vmem [resolvable:$true] %s27_s13  ;;  %s18_s15 = int_to_ptr.vmem [resolvable:$true] %s17_s15 }
   0x4   :  { %s388_s18 = scalar_lea.hbm %s613_s1, 128 }
   0x5   :  { %p389_p0 = scmp.ne.s32.totalorder %s613_s1, %s388_s18  ;;  %p392_p1 = scmp.lt.u32.totalorder %s388_s18, %s613_s1 }
   0x7   :  { %p394_p2 = pnand %p392_p1, %p389_p0 }
   0x9   :  { %397 = shalt.err (!%p394_p2)
}
   0xa   :  { %s398_s23 = scalar_lea.vmem %s28_s13, 128  ;;  %p403_p4 = scmp.lt.s32.totalorder %s28_s13, %s28_s13 }
   0xb   :  { %p399_p3 = scmp.ne.s32.totalorder %s28_s13, %s398_s23  ;;  %p404_p5 = scmp.lt.s32.totalorder %s398_s23, %s398_s23 }
   0xd   :  { %p405_p6 = por %p404_p5, %p403_p4 }
   0xf   :  { %p406_p7 = pnand %p405_p6, %p399_p3 }
  0x11   :  { %409 = shalt.err (!%p406_p7)
}
  0x12   :  { %30 = dma.hbm_to_vmem [thread:$0]  %s613_s1, 128, %s28_s13, [#allocation6]  }
  0x13   :  { %s410_s28 = scalar_lea.hbm %s612_s0, 256 }
  0x14   :  { %p411_p8 = scmp.ne.s32.totalorder %s612_s0, %s410_s28  ;;  %p414_p9 = scmp.lt.u32.totalorder %s410_s28, %s612_s0 }
  0x16   :  { %p416_p10 = pnand %p414_p9, %p411_p8 }
  0x18   :  { %419 = shalt.err (!%p416_p10)
}
  0x19   :  { %s420_s6 = scalar_lea.vmem %s18_s15, 256  ;;  %p425_p12 = scmp.lt.s32.totalorder %s18_s15, %s18_s15 }
  0x1a   :  { %p421_p11 = scmp.ne.s32.totalorder %s18_s15, %s420_s6  ;;  %p426_p13 = scmp.lt.s32.totalorder %s420_s6, %s420_s6 }
  0x1c   :  { %p427_p0 = por %p426_p13, %p425_p12 }
  0x1e   :  { %p428_p1 = pnand %p427_p0, %p421_p11 }
  0x20   :  { %431 = shalt.err (!%p428_p1)
}
  0x21   :  { %20 = dma.hbm_to_vmem [thread:$0]  %s612_s0, 256, %s18_s15, [#allocation3]  }
  0x22   :  { %s484_s8 = smov [#allocation7]   ;;  %s432_s12 = scalar_lea.hbm %s614_s2, 128 }
  0x23   :  { %s37_s9 = sshll.u32 %s484_s8, 4  ;;  %p433_p2 = scmp.ne.s32.totalorder %s614_s2, %s432_s12  ;;  %s38_s9 = int_to_ptr.vmem [resolvable:$true] %s37_s9 }
  0x24   :  { %p436_p3 = scmp.lt.u32.totalorder %s432_s12, %s614_s2 }
  0x26   :  { %p438_p4 = pnand %p436_p3, %p433_p2 }
  0x28   :  { %441 = shalt.err (!%p438_p4)
}
  0x29   :  { %s442_s18 = scalar_lea.vmem %s38_s9, 128  ;;  %p447_p6 = scmp.lt.s32.totalorder %s38_s9, %s38_s9 }
  0x2a   :  { %p443_p5 = scmp.ne.s32.totalorder %s38_s9, %s442_s18  ;;  %p448_p7 = scmp.lt.s32.totalorder %s442_s18, %s442_s18 }
  0x2c   :  { %p449_p8 = por %p448_p7, %p447_p6 }
  0x2e   :  { %p450_p9 = pnand %p449_p8, %p443_p5 }
  0x30   :  { %453 = shalt.err (!%p450_p9)
}
  0x31   :  { %40 = dma.hbm_to_vmem [thread:$0]  %s614_s2, 128, %s38_s9, [#allocation6]  }
  0x32   :  { %476 = dma.done.wait [#allocation3], 256  }
  0x33   :  { %477 = vsyncadd [#allocation3], 4294967040 }
  0x34   :  { %478 = dma.done.wait [#allocation6], 256  }
  0x35   :  { %479 = vsyncadd [#allocation6], 4294967040  ;;  %v58_v0 = vlaneseq  ;;  %v485_v1 = vmov 1983009808   ;;  %v50_v6 = vld [vmem:[#allocation2] sm:$0xff]  ;;  %v51_v7 = vld [vmem:[#allocation2 + $0x8] sm:$0xff] }
  0x36   :  { %v56_v2 = vunpack.c.l.s4 %v485_v1  ;;  %v54_v8 = vcombine.high %v50_v6, %v50_v6  ;;  %vm96_vm0 = vcmask 1041408   ;;  %v71_v12 = vcombine.high %v51_v7, %v51_v7  ;;  %s487_s2 = smov [#allocation8]  }
  0x37   :  { %v544_v3 = vshrl.u32 %v58_v0, 7  ;;  %v486_v33 = vmov 269488144   ;;  %s368_s19 = sshll.u32 %s487_s2, 4  ;;  %s369_s19 = int_to_ptr.vmem [resolvable:$true] %s368_s19 }
  0x38   :  { %v57_v4 = vunpack.c.0.s8 %v56_v2  ;;  %v117_v34 = vunpack.c.l.s4 %v486_v33  ;;  %s454_s20 = scalar_lea.vmem %s369_s19, 256  ;;  %p459_p11 = scmp.lt.s32.totalorder %s369_s19, %s369_s19 }
  0x39   :  { %p455_p10 = scmp.ne.s32.totalorder %s369_s19, %s454_s20  ;;  %p460_p12 = scmp.lt.s32.totalorder %s454_s20, %s454_s20 }
  0x3a   :  { %v547_v5 = vsub.s32 %v57_v4, %v544_v3  ;;  %v118_v35 = vunpack.c.0.s8 %v117_v34 }
  0x3b   :  { %p461_p13 = por %p460_p12, %p459_p11 }
  0x3c   :  { %v61_v9 = vrot.slane %v50_v6, %v547_v5  ;;  %v68_v10 = vrot.slane %v54_v8, %v547_v5  ;;  %v78_v13 = vrot.slane %v51_v7, %v547_v5  ;;  %v85_v19 = vrot.slane %v71_v12, %v547_v5 }
  0x3d   :  { %v121_v36 = vsub.s32 %v118_v35, %v544_v3  ;;  %v201_v12 = vsub.s32 1, %v544_v3  ;;  %p462_p0 = pnand %p461_p13, %p455_p10 }
  0x3e   :  { %v69_v11 = vcombine.high %v61_v9, %v61_v9  ;;  %v97_v14 = vsel %vm96_vm0, %v61_v9, 0.0  ;;  %v70_v15 = vcombine.high %v68_v10, %v68_v10  ;;  %v100_v17 = vsel %vm96_vm0, %v68_v10, 0.0  ;;  %v193_v10 = vld [vmem:[#allocation7] sm:$0xff] }
  0x3f   :  { %v86_v20 = vcombine.high %v78_v13, %v78_v13  ;;  %v104_v23 = vsel %vm96_vm0, %v78_v13, 0.0  ;;  %v87_v25 = vcombine.high %v85_v19, %v85_v19  ;;  %v108_v28 = vsel %vm96_vm0, %v85_v19, 0.0 }
  0x40   :  { %v98_v16 = vsel %vm96_vm0, %v69_v11, 0.0  ;;  %v102_v21 = vsel %vm96_vm0, %v70_v15, 0.0  ;;  %v197_v11 = vsub.s32 0, %v544_v3  ;;  %v205_v13 = vsub.s32 2, %v544_v3  ;;  %v192_v15 = vld [vmem:[#allocation5] sm:$0xff] }
  0x41   :  { %v99_v18 = vadd.f32 %v98_v16, %v97_v14  ;;  %v106_v26 = vsel %vm96_vm0, %v86_v20, 0.0  ;;  %v110_v30 = vsel %vm96_vm0, %v87_v25, 0.0  ;;  %v209_v14 = vsub.s32 3, %v544_v3 }
  0x42   :  { %v213_v16 = vsub.s32 4, %v544_v3  ;;  %v225_v19 = vsub.s32 7, %v544_v3  ;;  %v293_v20 = vrot.slane %v193_v10, %v197_v11 }
  0x43   :  { %v101_v22 = vadd.f32 %v100_v17, %v99_v18  ;;  %v217_v17 = vsub.s32 5, %v544_v3  ;;  %v221_v18 = vsub.s32 6, %v544_v3 }
  0x44   :  { %v226_v35 = vrot.slane %v192_v15, %v225_v19 }
  0x45   :  { %v103_v24 = vadd.f32 %v102_v21, %v101_v22  ;;  %v297_v21 = vrot.slane %v193_v10, %v201_v12  ;;  %v301_v22 = vrot.slane %v193_v10, %v205_v13  ;;  %v313_v25 = vrot.slane %v193_v10, %v217_v17 }
  0x46   :  { %v218_v33 = vrot.slane %v192_v15, %v217_v17  ;;  %v222_v34 = vrot.slane %v192_v15, %v221_v18 }
  0x47   :  { %v105_v27 = vadd.f32 %v104_v23, %v103_v24  ;;  %v305_v23 = vrot.slane %v193_v10, %v209_v14  ;;  %v309_v24 = vrot.slane %v193_v10, %v213_v16 }
  0x49   :  { %v107_v29 = vadd.f32 %v106_v26, %v105_v27  ;;  %v317_v26 = vrot.slane %v193_v10, %v221_v18  ;;  %v321_v27 = vrot.slane %v193_v10, %v225_v19  ;;  %v339_v3 = vcombine.low %v309_v24, %v313_v25 }
  0x4b   :  { %v109_v31 = vadd.f32 %v108_v28, %v107_v29  ;;  %v198_v28 = vrot.slane %v192_v15, %v197_v11  ;;  %v202_v29 = vrot.slane %v192_v15, %v201_v12 }
  0x4d   :  { %v111_v32 = vadd.f32 %v110_v30, %v109_v31  ;;  %v206_v30 = vrot.slane %v192_v15, %v205_v13  ;;  %v210_v31 = vrot.slane %v192_v15, %v209_v14 }
  0x4f   :  { %112 = vadd.xlane.f32.xlu0 %v111_v32  ;;  %v214_v32 = vrot.slane %v192_v15, %v213_v16 }
  0xdc   :  { %v113_v37 = vpop.xlane.xlu0 %112 }
  0xdd   :  { %v114_v38 = vmul.f32 0.0009765625, %v113_v37  ;;  %v323_v37 = vcombine.low %v301_v22, %v305_v23 }
  0xdf   :  { %v122_v39 = vrot.slane %v114_v38, %v121_v36  ;;  %v322_v36 = vcombine.low %v293_v20, %v297_v21 }
  0xe1   :  { %v562_v40 = vsub.f32 %v50_v6, %v122_v39  ;;  %v564_v41 = vsub.f32 %v51_v7, %v122_v39  ;;  %v340_v39 = vcombine.low %v317_v26, %v321_v27 }
  0xe3   :  { %v126_v42 = vmul.f32 %v562_v40, %v562_v40  ;;  %v127_v43 = vmul.f32 %v564_v41, %v564_v41 }
  0xe5   :  { %v130_v44 = vcombine.high %v126_v42, %v126_v42  ;;  %v137_v45 = vrot.slane %v126_v42, %v547_v5  ;;  %v154_v48 = vrot.slane %v127_v43, %v547_v5  ;;  %v147_v52 = vcombine.high %v127_v43, %v127_v43 }
  0xe7   :  { %v144_v46 = vrot.slane %v130_v44, %v547_v5  ;;  %v145_v47 = vcombine.high %v137_v45, %v137_v45  ;;  %v172_v49 = vsel %vm96_vm0, %v137_v45, 0.0  ;;  %v161_v56 = vrot.slane %v147_v52, %v547_v5 }
  0xe8   :  { %v162_v57 = vcombine.high %v154_v48, %v154_v48  ;;  %v179_v60 = vsel %vm96_vm0, %v154_v48, 0.0  ;;  %v330_v52 = vrot.slane %v322_v36, %v547_v5 }
  0xe9   :  { %v173_v50 = vsel %vm96_vm0, %v145_v47, 0.0  ;;  %v146_v51 = vcombine.high %v144_v46, %v144_v46  ;;  %v175_v54 = vsel %vm96_vm0, %v144_v46, 0.0  ;;  %v163_v62 = vcombine.high %v161_v56, %v161_v56 }
  0xea   :  { %v174_v53 = vadd.f32 %v173_v50, %v172_v49  ;;  %v181_v63 = vsel %vm96_vm0, %v162_v57, 0.0  ;;  %v183_v1 = vsel %vm96_vm0, %v161_v56, 0.0  ;;  %v347_v56 = vrot.slane %v339_v3, %v547_v5 }
  0xeb   :  { %v177_v58 = vsel %vm96_vm0, %v146_v51, 0.0  ;;  %v185_v4 = vsel %vm96_vm0, %v163_v62, 0.0  ;;  %v354_v57 = vrot.slane %v340_v39, %v547_v5 }
  0xec   :  { %v176_v55 = vadd.f32 %v175_v54, %v174_v53  ;;  %v337_v53 = vrot.slane %v323_v37, %v547_v5 }
  0xee   :  { %v178_v59 = vadd.f32 %v177_v58, %v176_v55 }
  0xf0   :  { %v180_v61 = vadd.f32 %v179_v60, %v178_v59 }
  0xf2   :  { %v182_v0 = vadd.f32 %v181_v63, %v180_v61  ;;  %v338_v63 = vcombine.low %v330_v52, %v337_v53 }
  0xf4   :  { %v184_v2 = vadd.f32 %v183_v1, %v182_v0  ;;  %v355_v1 = vcombine.low %v347_v56, %v354_v57 }
  0xf6   :  { %v186_v6 = vadd.f32 %v185_v4, %v184_v2 }
  0xf8   :  { %187 = vadd.xlane.f32.xlu0 %v186_v6 }
 0x185   :  { %v188_v7 = vpop.xlane.xlu0 %187 }
 0x186   :  { %v189_v8 = vmul.f32 0.0009765625, %v188_v7 }
 0x188   :  { %v190_v9 = vadd.f32 1e-05, %v189_v8 }
 0x18a   :  { %386 = vrsqrt.f32 %v190_v9 }
 0x194   :  { %v387_v38 = vpop.eup %386 }
 0x195   :  { %v235_v42 = vmul.f32 %v387_v38, %v198_v28  ;;  %v236_v43 = vmul.f32 %v387_v38, %v202_v29  ;;  %v237_v44 = vmul.f32 %v387_v38, %v206_v30  ;;  %v238_v45 = vmul.f32 %v387_v38, %v210_v31 }
 0x196   :  { %v239_v46 = vmul.f32 %v387_v38, %v214_v32  ;;  %v240_v47 = vmul.f32 %v387_v38, %v218_v33  ;;  %v241_v48 = vmul.f32 %v387_v38, %v222_v34  ;;  %v242_v49 = vmul.f32 %v387_v38, %v226_v35 }
 0x197   :  { %v251_v50 = vcombine.low %v235_v42, %v236_v43  ;;  %v252_v51 = vcombine.low %v237_v44, %v238_v45 }
 0x198   :  { %v268_v54 = vcombine.low %v239_v46, %v240_v47  ;;  %v269_v55 = vcombine.low %v241_v48, %v242_v49 }
 0x199   :  { %v259_v58 = vrot.slane %v251_v50, %v547_v5  ;;  %v266_v59 = vrot.slane %v252_v51, %v547_v5 }
 0x19a   :  { %v276_v60 = vrot.slane %v268_v54, %v547_v5  ;;  %v283_v61 = vrot.slane %v269_v55, %v547_v5 }
 0x19b   :  { %v267_v62 = vcombine.low %v259_v58, %v266_v59 }
 0x19c   :  { %v284_v0 = vcombine.low %v276_v60, %v283_v61 }
 0x19d   :  { %v287_v2 = vmul.f32 %v267_v62, %v562_v40 }
 0x19e   :  { %v288_v4 = vmul.f32 %v284_v0, %v564_v41 }
 0x19f   :  { %v358_v6 = vadd.f32 %v338_v63, %v287_v2 }
 0x1a0   :  { %v359_v7 = vadd.f32 %v355_v1, %v288_v4 }
 0x1a1   :  { %360 = vst [vmem:[#allocation8] sm:$0xff] %v358_v6 }
 0x1a2   :  { %361 = vst [vmem:[#allocation8 + $0x8] sm:$0xff] %v359_v7 }
 0x1a3   :  { %465 = shalt.err (!%p462_p0)
}
 0x1a4   :  { %s466_s23 = scalar_lea.hbm %s615_s3, 256 }
 0x1a5   :  { %p467_p1 = scmp.ne.s32.totalorder %s615_s3, %s466_s23  ;;  %p470_p2 = scmp.lt.u32.totalorder %s466_s23, %s615_s3 }
 0x1a7   :  { %p472_p3 = pnand %p470_p2, %p467_p1 }
 0x1a9   :  { %475 = shalt.err (!%p472_p3)
}
 0x1aa   :  { %371 = dma.vmem_to_hbm [thread:$0]  %s369_s19, 256, %s615_s3, [#allocation4]  }
 0x1ab   :  { %480 = dma.done.wait [#allocation4], 256  }
 0x1ac   :  { %481 = vsyncadd [#allocation4], 4294967040 }
 0x1ad   :  { %375 = vsyncpa [#allocation3], 1 }
 0x1ae   :  { %376 = vsyncpa [#allocation6], 1 }
 0x1af   :  { %377 = vsyncpa [#allocation4], 1 }

</bundles_post_ra>
